<compile_context>
chip_gen: v7x
topology: tpu7x:2x2x1
jax: 0.10.0
libtpu: 0.0.40
codegen_flags: <defaults>
</compile_context>

<pallas_src>
import functools
import math

import jax
import jax.numpy as jnp
from jax.experimental import pallas as pl
from jax.experimental.pallas import tpu as pltpu


def _round_up(x: int, m: int) -> int:
    return ((x + m - 1) // m) * m


def _cdiv(a: int, b: int) -> int:
    return (a + b - 1) // b


# ----------------------------------------------------------------------------
# Kernel: per-row streaming partial sums (row = one (batch, channel) pair).
#   x_ref, t_ref                      : (TM, TL) blocks of logits / targets
#   inter_ref, strue_ref, spred_ref   : (TM, 1) f32 resident output blocks
#                                        (accumulated across the L axis)
# Grid = (S parallel L-splits, M tiles, L tiles per split [reduction, last]).
# ----------------------------------------------------------------------------
def _dice_sums_kernel(x_ref, t_ref, inter_ref, strue_ref, spred_ref,
                      *, true_l, tl, tiles_per_split, need_mask):
    l = pl.program_id(2)

    @pl.when(l == 0)
    def _init():
        inter_ref[...] = jnp.zeros_like(inter_ref)
        strue_ref[...] = jnp.zeros_like(strue_ref)
        spred_ref[...] = jnp.zeros_like(spred_ref)

    x = x_ref[...].astype(jnp.float32)
    t = t_ref[...].astype(jnp.float32)
    p = jax.nn.sigmoid(x)  # EUP transcendental, f32

    if need_mask:
        # Global (unclamped) column index of this logical tile; columns >= L
        # (ragged tail or redundant clamped tile) contribute nothing.
        s = pl.program_id(0)
        col0 = (s * tiles_per_split + l) * tl
        col = col0 + jax.lax.broadcasted_iota(jnp.int32, x.shape, 1)
        valid = col < true_l
        p = jnp.where(valid, p, 0.0)
        t = jnp.where(valid, t, 0.0)

    inter_ref[...] += jnp.sum(t * p, axis=-1, keepdims=True)
    strue_ref[...] += jnp.sum(t * t, axis=-1, keepdims=True)
    spred_ref[...] += jnp.sum(p * p, axis=-1, keepdims=True)


# ----------------------------------------------------------------------------
# Wrapper: view as (M, L) -> pallas_call partial sums -> tiny dice/mean in JAX.
# ----------------------------------------------------------------------------
def dice_with_logits_loss(logits, y_true, *, smooth=1.0, reduction="mean"):
    assert logits.shape == y_true.shape, (logits.shape, y_true.shape)
    assert logits.ndim >= 2, "expected at least (H, W) trailing dims"
    *lead, H, W = logits.shape
    M = int(math.prod(lead)) if lead else 1
    L = H * W

    x2d = logits.reshape(M, L)
    t2d = y_true.reshape(M, L)

    # --- dtype-aware tile sizing -------------------------------------------
    isx = min(4, jnp.dtype(x2d.dtype).itemsize)
    ist = min(4, jnp.dtype(t2d.dtype).itemsize)
    sublane = max(8 * (4 // isx), 8 * (4 // ist))  # 8 f32 / 16 bf16 / 32 int8

    TM = min(_round_up(M, sublane), 256)

    # Couple TL to TM: target ~8 MiB of input bytes per grid step (both
    # operands), capped at 64K lanes; always a multiple of 128.
    target_step_bytes = 8 * 1024 * 1024
    tl_budget = target_step_bytes // (TM * (isx + ist))
    tl_budget = max(128, (tl_budget // 128) * 128)
    TL = min(_round_up(L, 128), tl_budget, 65536)

    Mt = _cdiv(M, TM)
    num_l_tiles = _cdiv(L, TL)
    # Ensure >= 2 blocks on a parallel axis (v7x megacore) when M fits one tile.
    S = 2 if (Mt == 1 and num_l_tiles >= 2) else 1
    tiles_per_split = _cdiv(num_l_tiles, S)
    last_tile = num_l_tiles - 1
    need_mask = (S * tiles_per_split * TL != L)
    M_pad = Mt * TM

    def in_map(s, i, l):
        # Clamp so redundant / tail tiles re-read valid data; the in-kernel
        # mask zeroes their contribution.
        return (i, jnp.minimum(s * tiles_per_split + l, last_tile))

    grid = (S, Mt, tiles_per_split)
    out_sds = jax.ShapeDtypeStruct((S, M_pad, 1), jnp.float32)
    out_spec = pl.BlockSpec((None, TM, 1), lambda s, i, l: (s, i, 0))

    partial_i, partial_t, partial_p = pl.pallas_call(
        functools.partial(
            _dice_sums_kernel,
            true_l=L, tl=TL, tiles_per_split=tiles_per_split,
            need_mask=need_mask),
        grid=grid,
        in_specs=[
            pl.BlockSpec((TM, TL), in_map),
            pl.BlockSpec((TM, TL), in_map),
        ],
        out_specs=[out_spec, out_spec, out_spec],
        out_shape=(out_sds, out_sds, out_sds),
        compiler_params=pltpu.CompilerParams(
            dimension_semantics=("parallel", "parallel", "arbitrary"),
            vmem_limit_bytes=32 * 1024 * 1024,
        ),
        cost_estimate=pl.CostEstimate(
            flops=6 * M * L,
            transcendentals=M * L,
            bytes_accessed=M * L * (isx + ist) + 3 * S * M_pad * 4,
        ),
    )(x2d, t2d)

    # Tiny O(M) finalization: combine parallel L-splits, crop padded rows,
    # compute dice and reduce.
    inter = jnp.sum(partial_i, axis=0)[:M, 0]
    s_true = jnp.sum(partial_t, axis=0)[:M, 0]
    s_pred = jnp.sum(partial_p, axis=0)[:M, 0]
    batch_dice = 1.0 - (2.0 * inter + smooth) / (s_true + s_pred + smooth)
    batch_dice = batch_dice.reshape(tuple(lead))

    if reduction is None:
        return batch_dice
    elif reduction == "mean":
        return jnp.mean(batch_dice)
    else:
        raise ValueError("unknown aggregation")


# Pure-JAX reference (independent of the kernel) for correctness checks.
def _ref_dice(logits, y_true, smooth=1.0, reduction="mean"):
    p = jax.nn.sigmoid(logits.astype(jnp.float32))
    t = y_true.astype(jnp.float32)
    inter = jnp.sum(t * p, axis=(-2, -1))
    s_true = jnp.sum(jnp.square(t), axis=(-2, -1))
    s_pred = jnp.sum(jnp.square(p), axis=(-2, -1))
    batch_dice = 1.0 - (2.0 * inter + smooth) / (s_true + s_pred + smooth)
    if reduction is None:
        return batch_dice
    return jnp.mean(batch_dice)


if __name__ == "__main__":
    key = jax.random.PRNGKey(0)
    k1, k2, k3, k4 = jax.random.split(key, 4)

    fwd_mean = jax.jit(lambda a, b: dice_with_logits_loss(
        a, b, smooth=1.0, reduction="mean"))
    fwd_none = jax.jit(lambda a, b: dice_with_logits_loss(
        a, b, smooth=1.0, reduction=None))

    # Case 1: aligned shapes (N*C multiple of 8, H*W multiple of 128).
    N, C, H, W = 2, 4, 16, 16
    logits = jax.random.normal(k1, (N, C, H, W), jnp.float32)
    y_true = jax.random.bernoulli(k2, 0.4, (N, C, H, W)).astype(jnp.float32)

    out_mean = jax.block_until_ready(fwd_mean(logits, y_true))
    out_none = jax.block_until_ready(fwd_none(logits, y_true))
    ref_mean = _ref_dice(logits, y_true, 1.0, "mean")
    ref_none = _ref_dice(logits, y_true, 1.0, None)
    assert out_mean.shape == (), out_mean.shape
    assert out_none.shape == (N, C), out_none.shape
    assert jnp.allclose(out_mean, ref_mean, atol=1e-5, rtol=1e-5), (
        float(jnp.max(jnp.abs(out_mean - ref_mean))))
    assert jnp.allclose(out_none, ref_none, atol=1e-5, rtol=1e-5), (
        float(jnp.max(jnp.abs(out_none - ref_none))))

    # Case 2: ragged shapes (exercises in-kernel tail masking, no HBM padding).
    N2, C2, H2, W2 = 2, 3, 14, 14
    logits2 = jax.random.normal(k3, (N2, C2, H2, W2), jnp.float32)
    y_true2 = jax.random.bernoulli(k4, 0.3, (N2, C2, H2, W2)).astype(jnp.float32)
    out2 = jax.block_until_ready(fwd_mean(logits2, y_true2))
    ref2 = _ref_dice(logits2, y_true2, 1.0, "mean")
    assert jnp.allclose(out2, ref2, atol=1e-5, rtol=1e-5), (
        float(jnp.abs(out2 - ref2)))

    print("KERNEL_OK")
</pallas_src>

<mosaic_0001>
module attributes {stable_mosaic.version = 11 : i64} {
  func.func @_dice_sums_kernel(%arg0: i32, %arg1: i32, %arg2: i32, %arg3: memref<8x256xf32, #tpu.memory_space<vmem>>, %arg4: memref<8x256xf32, #tpu.memory_space<vmem>>, %arg5: memref<1x8x1xf32, #tpu.memory_space<vmem>>, %arg6: memref<1x8x1xf32, #tpu.memory_space<vmem>>, %arg7: memref<1x8x1xf32, #tpu.memory_space<vmem>>) attributes {dimension_semantics = [#tpu.dimension_semantics<parallel>, #tpu.dimension_semantics<parallel>, #tpu.dimension_semantics<arbitrary>], iteration_bounds = array<i64: 1, 1, 1>, scalar_prefetch = 0 : i64, scratch_operands = 0 : i64, tpu.core_type = #tpu.core_type<tc>, window_params = [{transform_indices = @transform_0, window_bounds = array<i64: 8, 256>}, {transform_indices = @transform_1, window_bounds = array<i64: 8, 256>}, {transform_indices = @transform_2, window_bounds = array<i64: 1, 8, 1>}, {transform_indices = @transform_3, window_bounds = array<i64: 1, 8, 1>}, {transform_indices = @transform_4, window_bounds = array<i64: 1, 8, 1>}]} {
    %c0_i32 = arith.constant 0 : i32
    %0 = arith.cmpi eq, %arg2, %c0_i32 : i32
    %1 = arith.extui %0 : i1 to i32
    %c0_i32_0 = arith.constant 0 : i32
    %2 = arith.cmpi ne, %1, %c0_i32_0 : i32
    scf.if %2 {
      %cst_25 = arith.constant 0.000000e+00 : f32
      %37 = vector.broadcast %cst_25 : f32 to vector<8x1xf32>
      %c0_26 = arith.constant 0 : index
      %c0_27 = arith.constant 0 : index
      %c0_28 = arith.constant 0 : index
      %38 = vector.load %arg5[%c0_26, %c0_27, %c0_28] : memref<1x8x1xf32, #tpu.memory_space<vmem>>, vector<1x8x1xf32>
      %39 = vector.shape_cast %38 : vector<1x8x1xf32> to vector<8x1xf32>
      %40 = vector.shape_cast %37 : vector<8x1xf32> to vector<1x8x1xf32>
      tpu.vector_store %arg5[%c0_26, %c0_27, %c0_28], %40 {strides = array<i32>} : memref<1x8x1xf32, #tpu.memory_space<vmem>>, vector<1x8x1xf32>,
      %cst_29 = arith.constant 0.000000e+00 : f32
      %41 = vector.broadcast %cst_29 : f32 to vector<8x1xf32>
      %c0_30 = arith.constant 0 : index
      %c0_31 = arith.constant 0 : index
      %c0_32 = arith.constant 0 : index
      %42 = vector.load %arg6[%c0_30, %c0_31, %c0_32] : memref<1x8x1xf32, #tpu.memory_space<vmem>>, vector<1x8x1xf32>
      %43 = vector.shape_cast %42 : vector<1x8x1xf32> to vector<8x1xf32>
      %44 = vector.shape_cast %41 : vector<8x1xf32> to vector<1x8x1xf32>
      tpu.vector_store %arg6[%c0_30, %c0_31, %c0_32], %44 {strides = array<i32>} : memref<1x8x1xf32, #tpu.memory_space<vmem>>, vector<1x8x1xf32>,
      %cst_33 = arith.constant 0.000000e+00 : f32
      %45 = vector.broadcast %cst_33 : f32 to vector<8x1xf32>
      %c0_34 = arith.constant 0 : index
      %c0_35 = arith.constant 0 : index
      %c0_36 = arith.constant 0 : index
      %46 = vector.load %arg7[%c0_34, %c0_35, %c0_36] : memref<1x8x1xf32, #tpu.memory_space<vmem>>, vector<1x8x1xf32>
      %47 = vector.shape_cast %46 : vector<1x8x1xf32> to vector<8x1xf32>
      %48 = vector.shape_cast %45 : vector<8x1xf32> to vector<1x8x1xf32>
      tpu.vector_store %arg7[%c0_34, %c0_35, %c0_36], %48 {strides = array<i32>} : memref<1x8x1xf32, #tpu.memory_space<vmem>>, vector<1x8x1xf32>,
    } else {
    }
    %c0 = arith.constant 0 : index
    %c0_1 = arith.constant 0 : index
    %3 = vector.load %arg3[%c0, %c0_1] : memref<8x256xf32, #tpu.memory_space<vmem>>, vector<8x256xf32>
    %c0_2 = arith.constant 0 : index
    %c0_3 = arith.constant 0 : index
    %4 = vector.load %arg4[%c0_2, %c0_3] : memref<8x256xf32, #tpu.memory_space<vmem>>, vector<8x256xf32>
    %5 = arith.negf %3 : vector<8x256xf32>
    %6 = math.exp %5 : vector<8x256xf32>
    %cst = arith.constant 1.000000e+00 : f32
    %7 = vector.broadcast %cst : f32 to vector<8x256xf32>
    %8 = arith.addf %7, %6 : vector<8x256xf32>
    %9 = arith.divf %7, %8 : vector<8x256xf32>
    %c0_4 = arith.constant 0 : index
    %c0_5 = arith.constant 0 : index
    %c0_6 = arith.constant 0 : index
    %10 = vector.load %arg5[%c0_4, %c0_5, %c0_6] : memref<1x8x1xf32, #tpu.memory_space<vmem>>, vector<1x8x1xf32>
    %11 = vector.shape_cast %10 : vector<1x8x1xf32> to vector<8x1xf32>
    %12 = arith.mulf %4, %9 : vector<8x256xf32>
    %cst_7 = arith.constant dense<0.000000e+00> : vector<8xf32>
    %13 = vector.multi_reduction <add>, %12, %cst_7 [1] : vector<8x256xf32> to vector<8xf32>
    %14 = vector.shape_cast %13 : vector<8xf32> to vector<8x1xf32>
    %15 = arith.addf %11, %14 : vector<8x1xf32>
    %c0_8 = arith.constant 0 : index
    %c0_9 = arith.constant 0 : index
    %c0_10 = arith.constant 0 : index
    %16 = vector.load %arg5[%c0_8, %c0_9, %c0_10] : memref<1x8x1xf32, #tpu.memory_space<vmem>>, vector<1x8x1xf32>
    %17 = vector.shape_cast %16 : vector<1x8x1xf32> to vector<8x1xf32>
    %18 = vector.shape_cast %15 : vector<8x1xf32> to vector<1x8x1xf32>
    tpu.vector_store %arg5[%c0_8, %c0_9, %c0_10], %18 {strides = array<i32>} : memref<1x8x1xf32, #tpu.memory_space<vmem>>, vector<1x8x1xf32>,
    %c0_11 = arith.constant 0 : index
    %c0_12 = arith.constant 0 : index
    %c0_13 = arith.constant 0 : index
    %19 = vector.load %arg6[%c0_11, %c0_12, %c0_13] : memref<1x8x1xf32, #tpu.memory_space<vmem>>, vector<1x8x1xf32>
    %20 = vector.shape_cast %19 : vector<1x8x1xf32> to vector<8x1xf32>
    %21 = arith.mulf %4, %4 : vector<8x256xf32>
    %cst_14 = arith.constant dense<0.000000e+00> : vector<8xf32>
    %22 = vector.multi_reduction <add>, %21, %cst_14 [1] : vector<8x256xf32> to vector<8xf32>
    %23 = vector.shape_cast %22 : vector<8xf32> to vector<8x1xf32>
    %24 = arith.addf %20, %23 : vector<8x1xf32>
    %c0_15 = arith.constant 0 : index
    %c0_16 = arith.constant 0 : index
    %c0_17 = arith.constant 0 : index
    %25 = vector.load %arg6[%c0_15, %c0_16, %c0_17] : memref<1x8x1xf32, #tpu.memory_space<vmem>>, vector<1x8x1xf32>
    %26 = vector.shape_cast %25 : vector<1x8x1xf32> to vector<8x1xf32>
    %27 = vector.shape_cast %24 : vector<8x1xf32> to vector<1x8x1xf32>
    tpu.vector_store %arg6[%c0_15, %c0_16, %c0_17], %27 {strides = array<i32>} : memref<1x8x1xf32, #tpu.memory_space<vmem>>, vector<1x8x1xf32>,
    %c0_18 = arith.constant 0 : index
    %c0_19 = arith.constant 0 : index
    %c0_20 = arith.constant 0 : index
    %28 = vector.load %arg7[%c0_18, %c0_19, %c0_20] : memref<1x8x1xf32, #tpu.memory_space<vmem>>, vector<1x8x1xf32>
    %29 = vector.shape_cast %28 : vector<1x8x1xf32> to vector<8x1xf32>
    %30 = arith.mulf %9, %9 : vector<8x256xf32>
    %cst_21 = arith.constant dense<0.000000e+00> : vector<8xf32>
    %31 = vector.multi_reduction <add>, %30, %cst_21 [1] : vector<8x256xf32> to vector<8xf32>
    %32 = vector.shape_cast %31 : vector<8xf32> to vector<8x1xf32>
    %33 = arith.addf %29, %32 : vector<8x1xf32>
    %c0_22 = arith.constant 0 : index
    %c0_23 = arith.constant 0 : index
    %c0_24 = arith.constant 0 : index
    %34 = vector.load %arg7[%c0_22, %c0_23, %c0_24] : memref<1x8x1xf32, #tpu.memory_space<vmem>>, vector<1x8x1xf32>
    %35 = vector.shape_cast %34 : vector<1x8x1xf32> to vector<8x1xf32>
    %36 = vector.shape_cast %33 : vector<8x1xf32> to vector<1x8x1xf32>
    tpu.vector_store %arg7[%c0_22, %c0_23, %c0_24], %36 {strides = array<i32>} : memref<1x8x1xf32, #tpu.memory_space<vmem>>, vector<1x8x1xf32>,
    return
  }
  func.func @transform_0(%arg0: i32, %arg1: i32, %arg2: i32) -> (i32, i32) {
    %c1_i32 = arith.constant 1 : i32
    %0 = arith.muli %arg0, %c1_i32 : i32
    %1 = arith.addi %0, %arg2 : i32
    %c0_i32 = arith.constant 0 : i32
    %2 = arith.minsi %1, %c0_i32 : i32
    %c0_i32_0 = arith.constant 0 : i32
    return %arg1, %2 : i32, i32
  }
  func.func @transform_1(%arg0: i32, %arg1: i32, %arg2: i32) -> (i32, i32) {
    %c1_i32 = arith.constant 1 : i32
    %0 = arith.muli %arg0, %c1_i32 : i32
    %1 = arith.addi %0, %arg2 : i32
    %c0_i32 = arith.constant 0 : i32
    %2 = arith.minsi %1, %c0_i32 : i32
    %c0_i32_0 = arith.constant 0 : i32
    return %arg1, %2 : i32, i32
  }
  func.func @transform_2(%arg0: i32, %arg1: i32, %arg2: i32) -> (i32, i32, i32) {
    %c0_i32 = arith.constant 0 : i32
    %c0_i32_0 = arith.constant 0 : i32
    return %arg0, %arg1, %c0_i32 : i32, i32, i32
  }
  func.func @transform_3(%arg0: i32, %arg1: i32, %arg2: i32) -> (i32, i32, i32) {
    %c0_i32 = arith.constant 0 : i32
    %c0_i32_0 = arith.constant 0 : i32
    return %arg0, %arg1, %c0_i32 : i32, i32, i32
  }
  func.func @transform_4(%arg0: i32, %arg1: i32, %arg2: i32) -> (i32, i32, i32) {
    %c0_i32 = arith.constant 0 : i32
    %c0_i32_0 = arith.constant 0 : i32
    return %arg0, %arg1, %c0_i32 : i32, i32, i32
  }
}

</mosaic_0001>

<bundles_post_ra>
// kernel: _lambda_.1
= control target key start
LH: loop header
LB: loop body
LE: loop exit
PB: predicated region body
PF: predicated region fallthrough
CT: control target
= control target key end

     0   :  { %vm82_vm0 = vcmask 7168   ;;  %v162_v2 = vmov 0.0   ;;  %s233_s0 = inlined_call_operand.vmem [shape: f32[8,256], index: 0, kind: input, shape index: {}]   ;;  %s234_s2 = inlined_call_operand.vmem [shape: f32[1,8,1], index: 2, kind: output, shape index: {0}]   ;;  %s235_s1 = inlined_call_operand.vmem [shape: f32[8,256], index: 1, kind: input, shape index: {}]   ;;  %s236_s4 = inlined_call_operand.vmem [shape: f32[1,8,1], index: 4, kind: output, shape index: {2}]   ;;  %s237_s3 = inlined_call_operand.vmem [shape: f32[1,8,1], index: 3, kind: output, shape index: {1}]  }
   0x1   :  { %v86_v0 = vld [vmem:[%s233_s0] sm:$0xff]  ;;  %v87_v1 = vld [vmem:[%s233_s0 + $0x8] sm:$0xff]  ;;  %83 = vst.msk [vmem:[%s234_s2] sm:$0xff] %vm82_vm0, %v162_v2  ;;  %85 = vst.msk [vmem:[%s236_s4] sm:$0xff] %vm82_vm0, %v162_v2 }
   0x2   :  { %v151_v3 = vmul.f32 -1.442695, %v86_v0  ;;  %v152_v4 = vmul.f32 -1.442695, %v87_v1  ;;  %v88_v9 = vld [vmem:[%s235_s1] sm:$0xff]  ;;  %v89_v10 = vld [vmem:[%s235_s1 + $0x8] sm:$0xff] }
   0x3   :  { %v112_v17 = vmul.f32 %v88_v9, %v88_v9  ;;  %v113_v18 = vmul.f32 %v89_v10, %v89_v10  ;;  %84 = vst.msk [vmem:[%s237_s3] sm:$0xff] %vm82_vm0, %v162_v2 }
   0x4   :  { %154 = vpow2.f32 %v151_v3 }
   0x5   :  { %156 = vpow2.f32 %v152_v4  ;;  %v114_v21 = vadd.f32 %v113_v18, %v112_v17 }
   0x8   :  { %v102_v22 = vld [vmem:[%s234_s2] sm:$0xff] }
   0x9   :  { %v119_v23 = vld [vmem:[%s236_s4] sm:$0xff] }
   0xa   :  { %v111_v28 = vld [vmem:[%s237_s3] sm:$0xff] }
   0xe   :  { %v155_v5 = vpop.eup %154 }
   0xf   :  { %v157_v6 = vpop.eup %156  ;;  %v96_v7 = vadd.f32 1.0, %v155_v5 }
  0x10   :  { %v97_v8 = vadd.f32 1.0, %v157_v6 }
  0x11   :  { %158 = vrcp.f32 %v96_v7 }
  0x12   :  { %160 = vrcp.f32 %v97_v8 }
  0x1b   :  { %v159_v11 = vpop.eup %158 }
  0x1c   :  { %v161_v12 = vpop.eup %160  ;;  %v103_v13 = vmul.f32 %v159_v11, %v88_v9  ;;  %v120_v14 = vmul.f32 %v159_v11, %v159_v11 }
  0x1d   :  { %v104_v15 = vmul.f32 %v161_v12, %v89_v10  ;;  %v121_v16 = vmul.f32 %v161_v12, %v161_v12 }
  0x1f   :  { %v105_v19 = vadd.f32 %v104_v15, %v103_v13  ;;  %v122_v20 = vadd.f32 %v121_v16, %v120_v14 }
  0x21   :  { %106 = vadd.xlane.f32.xlu0 %v105_v19  ;;  %123 = vadd.xlane.f32.xlu1 %v122_v20 }
  0x25   :  { %115 = vadd.xlane.f32.xlu0 %v114_v21 }
  0xae   :  { %v107_v24 = vpop.xlane.xlu0 %106  ;;  %v124_v25 = vpop.xlane.xlu1 %123 }
  0xaf   :  { %v108_v26 = vadd.f32 %v107_v24, %v102_v22  ;;  %v125_v27 = vadd.f32 %v124_v25, %v119_v23 }
  0xb1   :  { %110 = vst.msk [vmem:[%s234_s2] sm:$0xff] %vm82_vm0, %v108_v26  ;;  %126 = vst.msk [vmem:[%s236_s4] sm:$0xff] %vm82_vm0, %v125_v27 }
  0xb2   :  { %v116_v29 = vpop.xlane.xlu0 %115 }
  0xb3   :  { %v117_v30 = vadd.f32 %v116_v29, %v111_v28 }
  0xb5   :  { %118 = vst.msk [vmem:[%s237_s3] sm:$0xff] %vm82_vm0, %v117_v30 }

</bundles_post_ra>
